<compile_context>
chip_gen: v7x
topology: tpu7x:2x2x1
jax: 0.10.0
libtpu: 0.0.40
codegen_flags: <defaults>
</compile_context>

<pallas_src>
import jax
import jax.numpy as jnp
from jax.experimental import pallas as pl
from jax.experimental.pallas import tpu as pltpu


def _round_up(x, m):
    return ((x + m - 1) // m) * m


def _constraint_kernel(lmbda_ref, value_ref, out_ref):
    # lmbda_ref: (K,) f32, scalar-prefetched into SMEM.
    # value_ref: (K, TR, C) block in VMEM (TR sublane-aligned, C lane-dense).
    # out_ref:   (TR, C) block in VMEM.
    k_dim = value_ref.shape[0]  # static: 4 ('dp') or 8 ('eo')
    # Unrolled scalar*slab FMAs over dense (TR, C) vregs -- pure VPU work,
    # no MXU, no cross-lane/sublane reductions, f32 accumulation.
    acc = lmbda_ref[0] * value_ref[0].astype(jnp.float32)
    for k in range(1, k_dim):
        acc = acc + lmbda_ref[k] * value_ref[k].astype(jnp.float32)
    out_ref[...] = acc.astype(out_ref.dtype)


def constraint_forward(lmbda, value, *, row_tile=None, lane_c=128,
                       kernel_min_bytes=1 << 20):
    """Pallas equivalent of Constraint.forward: returns lmbda.T @ value.

    lmbda: (K, 1), value: (K, N) -> (1, N),  K = 4 ('dp') or 8 ('eo').
    """
    K, N = value.shape
    assert lmbda.shape == (K, 1), (lmbda.shape, value.shape)
    out_dtype = jnp.promote_types(lmbda.dtype, value.dtype)

    # ---- small-problem fast path (toy module shapes) -----------------------
    # Below ~1 MiB of input the pallas dispatch + per-step overhead dominates;
    # let XLA fuse the identical math into the surrounding graph.
    if K * N * value.dtype.itemsize < kernel_min_bytes:
        acc = jnp.sum(lmbda.astype(jnp.float32) * value.astype(jnp.float32),
                      axis=0, keepdims=True)
        return acc.astype(out_dtype)

    # ---- dense (K, R, C) restructure ---------------------------------------
    C = lane_c
    assert C % 128 == 0, "lane dimension must be lane-dense (multiple of 128)"
    n_pad = _round_up(N, C)
    # Padding only triggers when N is not already a multiple of C=128 (at most
    # 127 extra columns); it costs one extra input copy, so the common large-N
    # lane-aligned case is zero-copy.
    value_p = value if n_pad == N else jnp.pad(value, ((0, 0), (0, n_pad - N)))
    R = n_pad // C
    value_3d = value_p.reshape(K, R, C)  # row-major reshape: free

    itemsize = value.dtype.itemsize
    out_itemsize = jnp.dtype(out_dtype).itemsize

    if row_tile is None:
        # ~2 MiB of streamed input per grid step: well past the ~0.35 us/step
        # overhead break-even, and 2*(in+out) double-buffered VMEM stays
        # ~5-6 MiB (inside the default scoped VMEM on v5e/v6e/v7x, no flags).
        row_tile = max(8, (2 * 1024 * 1024) // (K * C * itemsize))
        # Keep the grid >= 8 steps when R allows it so the "parallel" axis can
        # actually be split across both TensorCores on v7x.
        row_tile = min(row_tile, max(8, pl.cdiv(R, 8)))

    if R <= 8:
        tr = R                                   # full extent, single step
    else:
        tr = max(8, (min(row_tile, R) // 8) * 8)  # sublane-aligned tile

    grid_len = pl.cdiv(R, tr)  # ragged last block handled by Pallas masking
    lmbda_flat = lmbda.reshape(K).astype(jnp.float32)

    cost = pl.CostEstimate(
        flops=2 * K * R * C,
        transcendentals=0,
        bytes_accessed=(K * itemsize + out_itemsize) * R * C,
    )

    out2d = pl.pallas_call(
        _constraint_kernel,
        out_shape=jax.ShapeDtypeStruct((R, C), out_dtype),
        grid_spec=pltpu.PrefetchScalarGridSpec(
            num_scalar_prefetch=1,            # lmbda -> SMEM before the grid
            grid=(grid_len,),
            in_specs=[pl.BlockSpec((K, tr, C), lambda i, lam: (0, i, 0))],
            out_specs=pl.BlockSpec((tr, C), lambda i, lam: (i, 0)),
        ),
        compiler_params=pltpu.CompilerParams(
            dimension_semantics=("parallel",),  # v7x: split R across both TCs
        ),
        cost_estimate=cost,
    )(lmbda_flat, value_3d)

    loss = out2d.reshape(1, n_pad)
    return loss if n_pad == N else loss[:, :N]


def make_constraint_params(fair, bound, key):
    """Deterministic stand-in for Constraint.__init__ (torch.rand init)."""
    if fair == "dp":
        k = 4
    elif fair == "eo":
        k = 8
    else:
        raise ValueError(f"unknown fair mode: {fair}")
    lmbda = jax.random.uniform(key, (k, 1), dtype=jnp.float32)  # ~ torch.rand
    inv_bound = 1.0 / bound  # stored but unused in forward (matches PyTorch)
    return lmbda, inv_bound


if __name__ == "__main__":
    key = jax.random.PRNGKey(0)
    k_l1, k_l2, k_v1, k_v2, k_v3 = jax.random.split(key, 5)

    def ref_forward(lmbda, value):
        return jnp.sum(lmbda.astype(jnp.float32) * value.astype(jnp.float32),
                       axis=0, keepdims=True)

    lmbda_dp, _ = make_constraint_params("dp", 0.1, k_l1)   # (4, 1)
    lmbda_eo, _ = make_constraint_params("eo", 0.1, k_l2)   # (8, 1)

    # Case 1: toy module shape (4, 8) -> automatic small-problem fast path.
    v1 = jax.random.normal(k_v1, (4, 8), dtype=jnp.float32)
    o1 = jax.block_until_ready(constraint_forward(lmbda_dp, v1))
    assert o1.shape == (1, 8)
    assert jnp.allclose(o1, ref_forward(lmbda_dp, v1), atol=1e-5, rtol=1e-5)

    # Case 2: force the Pallas path; N multiple of 128 -> zero-copy reshape,
    # default row tiling -> multi-step pipelined "parallel" grid.
    v2 = jax.random.normal(k_v2, (4, 8192), dtype=jnp.float32)
    o2 = jax.block_until_ready(
        constraint_forward(lmbda_dp, v2, kernel_min_bytes=0))
    assert o2.shape == (1, 8192)
    assert jnp.allclose(o2, ref_forward(lmbda_dp, v2), atol=1e-5, rtol=1e-5)

    # Case 2b: explicit row_tile leaving a ragged last grid block (edge-block
    # masking path).
    o2b = jax.block_until_ready(
        constraint_forward(lmbda_dp, v2, kernel_min_bytes=0, row_tile=24))
    assert jnp.allclose(o2b, ref_forward(lmbda_dp, v2), atol=1e-5, rtol=1e-5)

    # Case 3: 'eo' (K=8) with ragged N=300 -> minimal pad-to-128 + slice-back.
    v3 = jax.random.normal(k_v3, (8, 300), dtype=jnp.float32)
    o3 = jax.block_until_ready(
        constraint_forward(lmbda_eo, v3, kernel_min_bytes=0))
    assert o3.shape == (1, 300)
    assert jnp.allclose(o3, ref_forward(lmbda_eo, v3), atol=1e-5, rtol=1e-5)

    print("KERNEL_OK")
</pallas_src>

<mosaic_0001>
module attributes {stable_mosaic.version = 11 : i64} {
  func.func @_constraint_kernel(%arg0: i32, %arg1: memref<4xf32, #tpu.memory_space<smem>>, %arg2: memref<4x8x128xf32, #tpu.memory_space<vmem>>, %arg3: memref<8x128xf32, #tpu.memory_space<vmem>>) attributes {dimension_semantics = [#tpu.dimension_semantics<parallel>], iteration_bounds = array<i64: 8>, scalar_prefetch = 1 : i64, scratch_operands = 0 : i64, tpu.core_type = #tpu.core_type<tc>, window_params = [{transform_indices = @transform_0, window_bounds = array<i64: 4, 8, 128>}, {transform_indices = @transform_1, window_bounds = array<i64: 8, 128>}]} {
    %c0 = arith.constant 0 : index
    %0 = memref.load %arg1[%c0] : memref<4xf32, #tpu.memory_space<smem>>
    %c0_0 = arith.constant 0 : index
    %c0_1 = arith.constant 0 : index
    %c0_2 = arith.constant 0 : index
    %1 = vector.load %arg2[%c0_0, %c0_1, %c0_2] : memref<4x8x128xf32, #tpu.memory_space<vmem>>, vector<1x8x128xf32>
    %2 = vector.shape_cast %1 : vector<1x8x128xf32> to vector<8x128xf32>
    %3 = vector.broadcast %0 : f32 to vector<8x128xf32>
    %4 = arith.mulf %3, %2 : vector<8x128xf32>
    %c1 = arith.constant 1 : index
    %5 = memref.load %arg1[%c1] : memref<4xf32, #tpu.memory_space<smem>>
    %c1_3 = arith.constant 1 : index
    %c0_4 = arith.constant 0 : index
    %c0_5 = arith.constant 0 : index
    %6 = vector.load %arg2[%c1_3, %c0_4, %c0_5] : memref<4x8x128xf32, #tpu.memory_space<vmem>>, vector<1x8x128xf32>
    %7 = vector.shape_cast %6 : vector<1x8x128xf32> to vector<8x128xf32>
    %8 = vector.broadcast %5 : f32 to vector<8x128xf32>
    %9 = arith.mulf %8, %7 : vector<8x128xf32>
    %10 = arith.addf %4, %9 : vector<8x128xf32>
    %c2 = arith.constant 2 : index
    %11 = memref.load %arg1[%c2] : memref<4xf32, #tpu.memory_space<smem>>
    %c2_6 = arith.constant 2 : index
    %c0_7 = arith.constant 0 : index
    %c0_8 = arith.constant 0 : index
    %12 = vector.load %arg2[%c2_6, %c0_7, %c0_8] : memref<4x8x128xf32, #tpu.memory_space<vmem>>, vector<1x8x128xf32>
    %13 = vector.shape_cast %12 : vector<1x8x128xf32> to vector<8x128xf32>
    %14 = vector.broadcast %11 : f32 to vector<8x128xf32>
    %15 = arith.mulf %14, %13 : vector<8x128xf32>
    %16 = arith.addf %10, %15 : vector<8x128xf32>
    %c3 = arith.constant 3 : index
    %17 = memref.load %arg1[%c3] : memref<4xf32, #tpu.memory_space<smem>>
    %c3_9 = arith.constant 3 : index
    %c0_10 = arith.constant 0 : index
    %c0_11 = arith.constant 0 : index
    %18 = vector.load %arg2[%c3_9, %c0_10, %c0_11] : memref<4x8x128xf32, #tpu.memory_space<vmem>>, vector<1x8x128xf32>
    %19 = vector.shape_cast %18 : vector<1x8x128xf32> to vector<8x128xf32>
    %20 = vector.broadcast %17 : f32 to vector<8x128xf32>
    %21 = arith.mulf %20, %19 : vector<8x128xf32>
    %22 = arith.addf %16, %21 : vector<8x128xf32>
    %c0_12 = arith.constant 0 : index
    %c0_13 = arith.constant 0 : index
    %23 = vector.load %arg3[%c0_12, %c0_13] : memref<8x128xf32, #tpu.memory_space<vmem>>, vector<8x128xf32>
    tpu.vector_store %arg3[%c0_12, %c0_13], %22 {strides = array<i32>} : memref<8x128xf32, #tpu.memory_space<vmem>>, vector<8x128xf32>,
    return
  }
  func.func @transform_0(%arg0: i32, %arg1: memref<4xf32, #tpu.memory_space<smem>>) -> (i32, i32, i32) {
    %c0_i32 = arith.constant 0 : i32
    %c0_i32_0 = arith.constant 0 : i32
    %c0_i32_1 = arith.constant 0 : i32
    return %c0_i32, %arg0, %c0_i32_0 : i32, i32, i32
  }
  func.func @transform_1(%arg0: i32, %arg1: memref<4xf32, #tpu.memory_space<smem>>) -> (i32, i32) {
    %c0_i32 = arith.constant 0 : i32
    %c0_i32_0 = arith.constant 0 : i32
    return %arg0, %c0_i32 : i32, i32
  }
}

</mosaic_0001>

<bundles_post_ra>
// kernel: tpu_custom_call.1
= control target key start
LH: loop header
LB: loop body
LE: loop exit
PB: predicated region body
PF: predicated region fallthrough
CT: control target
= control target key end

     0   :  { %s618_s0 = inlined_call_operand.hbm [shape: f32[4], index: 0, kind: input, shape index: {}]   ;;  %s619_s1 = inlined_call_operand.hbm [shape: f32[4,64,128], index: 1, kind: input, shape index: {}]   ;;  %s620_s2 = inlined_call_operand.hbm [shape: f32[64,128], index: 2, kind: output, shape index: {}]  }
   0x1   :  { %s314_s11 = scalar_lea.hbm %s618_s0, 16 }
   0x2   :  { %p315_p0 = scmp.ne.s32.totalorder %s618_s0, %s314_s11  ;;  %p318_p1 = scmp.lt.u32.totalorder %s314_s11, %s618_s0 }
   0x4   :  { %p320_p2 = pnand %p318_p1, %p315_p0 }
   0x6   :  { %323 = shalt.err (!%p320_p2)  }
   0x7   :  { %s424_s16 = smov [#allocation3]  }
   0x8   :  { %8 = dma.hbm_to_smem %s618_s0, 16, %s424_s16, [#allocation2] }
   0x9   :  { %398 = dma.done.wait [#allocation2], 16 }
   0xa   :  { %399 = vsyncadd [#allocation2], 4294967280 }
   0xb   :  { %10 = sfence }
   0xc   :  { %11 = vsyncpa [#allocation5], 0 }
   0xd   :  { %13 = vsyncpa [#allocation5 + $0x1], 0 }
   0xe   :  { %14 = vsyncpa [#allocation6], 0 }
   0xf   :  { %16 = vsyncpa [#allocation6 + $0x1], 0  ;;  %s457_s19 = smov 0   ;;  %s459_s20 = smov 0  }
  0x10   :  { %s461_s21 = smov 0   ;;  %s463_s22 = smov 0  }
  0x11 LB: > { %s478_s0 = sadd.s32 4294967295, %s422_s22   ;;  %s246_s23 = sadd.s32 4294967294, %s422_s22   ;;  %s422_s22 = sphi %s463_s22, %s633_s22   ;;  %s418_s21 = sphi %s461_s21, %s632_s21   ;;  %s414_s20 = sphi %s459_s20, %s631_s20   ;;  %s410_s19 = sphi %s457_s19, %s630_s19  }
  0x12   : > { %s482_s24 = sadd.s32 1, %s422_s22   ;;  %s29_s25 = sadd.s32 1, %s418_s21 }
  0x13   : > { %s26_s26 = ssub.s32 %s422_s22, %s482_s24  ;;  %p36_p3 = scmp.ne.s32.totalorder %s418_s21, %s414_s20 }
  0x14   : > { %p27_p4 = scmp.eq.s32.totalorder %s26_s26, 0  ;;  %p37_p5 = scmp.eq.s32.totalorder %s422_s22, 0 }
  0x15   : > { %p42_p6 = scmp.ne.s32.totalorder %s414_s20, %s410_s19  ;;  %p43_p7 = scmp.eq.s32.totalorder %s478_s0, 0 }
  0x16   : > { %s494_s27 = scalar_select %p27_p4, %s418_s21, %s29_s25  }
  0x17   : > { %p496_p8 = por %p37_p5, %p36_p3  ;;  %p500_p9 = por %p43_p7, %p42_p6 }
  0x18   : > { %p66_p10 = scmp.eq.s32.totalorder %s478_s0, 7  ;;  %p72_p11 = scmp.eq.s32.totalorder %s246_s23, 7 }
  0x19   : > { %p276_p12 = scmp.lt.s32.totalorder %s422_s22, 8  ;;  %s92_s4 = sand.u32 1, %s418_s21  }
  0x1a   : > { %p506_p13 = por %p66_p10, %p36_p3  ;;  %p510_p0 = por %p72_p11, %p42_p6 }
  0x1b   : > { %s250_s5 = sshll.u32 %s422_s22, 7  ;;  %s249_s6 = sshll.u32 %s92_s4, 5 }
  0x1c   : > { %s624_s30 = scalar_select %p506_p13, 1, 0 }
  0x1d   : > { %s625_s3 = scalar_select %p510_p0, 1, 0 }
  0x1e   : > { %s519_s9 = scalar_lea.hbm %s619_s1, %s250_s5  ;;  %s96_s10 = scalar_lea.vmem [#allocation4], %s249_s6 }
  0x1f   : > { %s102_s11 = sshll.u32 %s96_s10, 4  ;;  %p523_p1 = pnand %p276_p12, %p496_p8  ;;  %s527_s11 = int_to_ptr.vmem [resolvable:$true] %s102_s11 }
  0x20   : > { %s530_s13 = scalar_lea.sflag [#allocation5], %s92_s4  ;;  %s324_s14 = scalar_lea.hbm %s519_s9, 512 }
  0x21   : > { %p325_p3 = scmp.ne.s32.totalorder %s519_s9, %s324_s14  ;;  %p326_p4 = pneg %p523_p1 }
  0x22   : > { %s329_s17 = scalar_lea.hbm %s619_s1, 4096  ;;  %p330_p7 = scmp.lt.u32.totalorder %s519_s9, %s619_s1 }
  0x23   : > { %p327_p5 = pnand %p326_p4, %p325_p3  ;;  %p331_p8 = scmp.lt.u32.totalorder %s329_s17, %s324_s14 }
  0x24   : > { %p333_p11 = scmp.lt.u32.totalorder %s324_s14, %s519_s9 }
  0x25   : > { %p328_p6 = pneg %p327_p5  ;;  %p332_p10 = por %p331_p8, %p330_p7 }
  0x27   : > { %p334_p12 = por %p333_p11, %p332_p10 }
  0x29   : > { %p335_p2 = pnand %p334_p12, %p328_p6 }
  0x2b   : > { %338 = shalt.err (!%p335_p2)
}
  0x2c   : > { %s339_s25 = scalar_lea.vmem %s527_s11, 512  ;;  %s425_s26 = smov [#allocation4]  }
  0x2d   : > { %p340_p3 = scmp.ne.s32.totalorder %s527_s11, %s339_s25  ;;  %s344_s28 = sshll.u32 %s425_s26, 4  ;;  %s345_s28 = int_to_ptr.vmem [resolvable:$false] %s344_s28 }
  0x2e   : > { %s346_s4 = scalar_lea.vmem %s345_s28, 1024  ;;  %p347_p13 = scmp.lt.s32.totalorder %s527_s11, %s345_s28 }
  0x2f   : > { %p342_p5 = pnand %p340_p3, %p326_p4  ;;  %p348_p7 = scmp.lt.s32.totalorder %s346_s4, %s339_s25 }
  0x31   : > { %p343_p0 = pneg %p342_p5  ;;  %p349_p8 = por %p348_p7, %p347_p13 }
  0x33   : > { %p350_p10 = pnand %p349_p8, %p343_p0 }
  0x35   : > { %353 = shalt.err (!%p350_p10)
}
  0x36   : > { %s426_s5 = smov 1024   ;;  %s427_s6 = smov 128  }
  0x37   : > { %s428_s7 = smov 8   ;;  %p110_p2 = scmp.lt.s32.totalorder %s422_s22, 9 }
  0x38   : > { %271 = dma.hbm_to_vmem [thread:$0]  (!%p523_p1), %s519_s9, 512, %s527_s11, %s530_s13, %s426_s5, %s427_s6, %s428_s7  }
  0x39   : > { %p627_p4 = scmp.ge.s32.totalorder %s422_s22, 1 }
  0x3b   : > { %p111_p6 = pnand %p627_p4, %p110_p2 }
  0x3c   : > { %s562_s8 = sand.u32 (!%p111_p6), 1, %s414_s20  }
  0x3d   : > { %114 = sbr.rel (%p111_p6) target bundleno = 98 (0x62), region = 24  ;;  %s252_s10 = sshll.u32 (!%p111_p6), %s562_s8, 5 }
  0x3e   : > { %s117_s14 = scalar_lea.sflag (!%p111_p6), [#allocation5], %s562_s8  ;;  %s120_s15 = scalar_lea.vmem (!%p111_p6), [#allocation4], %s252_s10 }
  0x44   : > { %401 = dma.done.wait (%p500_p9), %s117_s14, 512  }
  0x45   : > { %403 = vsyncadd (%p500_p9), %s117_s14, 4294966784  ;;  %s139_s9 = sld [smem:[#allocation3]]  ;;  %s254_s11 = sld [smem:[#allocation3 + $0x1]]  ;;  %v140_v0 = vld [vmem:[%s120_s15] sm:$0xff]  ;;  %v255_v2 = vld [vmem:[%s120_s15 + $0x8] sm:$0xff] }
  0x46   : > { %s256_s12 = sld [smem:[#allocation3 + $0x2]]  ;;  %s258_s13 = sld [smem:[#allocation3 + $0x3]]  ;;  %v257_v3 = vld [vmem:[%s120_s15 + $0x10] sm:$0xff]  ;;  %v259_v7 = vld [vmem:[%s120_s15 + $0x18] sm:$0xff] }
  0x47   : > { %s253_s16 = sshll.u32 %s562_s8, 3  ;;  %s261_s18 = sshll.u32 %s478_s0, 7 }
  0x48   : > { %s138_s29 = scalar_lea.vmem [#allocation7], %s253_s16  ;;  %s577_s26 = scalar_lea.hbm %s620_s2, %s261_s18 }
  0x49   : > { %s176_s17 = sshll.u32 %s138_s29, 4  ;;  %s163_s28 = scalar_lea.sflag [#allocation6], %s562_s8  ;;  %s572_s17 = int_to_ptr.vmem [resolvable:$true] %s176_s17 }
  0x4a   : > { %s354_s4 = scalar_lea.vmem %s572_s17, 128  ;;  %p628_p13 = scmp.ne.s32.totalorder %s624_s30, 0 }
  0x4b   : > { %v141_v1 = vstv %s139_s9  ;;  %v146_v5 = vstv %s254_s11  ;;  %p355_p9 = scmp.ne.s32.totalorder %s572_s17, %s354_s4  ;;  %s429_s0 = smov [#allocation7]  }
  0x4c   : > { %v142_v4 = vmul.f32 %v141_v1, %v140_v0  ;;  %v152_v6 = vstv %s256_s12  ;;  %v147_v8 = vmul.f32 %v255_v2, %v146_v5  ;;  %v158_v10 = vstv %s258_s13  ;;  %s358_s5 = sshll.u32 %s429_s0, 4  ;;  %s359_s5 = int_to_ptr.vmem [resolvable:$false] %s358_s5 }
  0x4d   : > { %v153_v9 = vmul.f32 %v257_v3, %v152_v6  ;;  %v159_v12 = vmul.f32 %v259_v7, %v158_v10  ;;  %p356_p0 = pnand %p355_p9, %p628_p13  ;;  %s360_s6 = scalar_lea.vmem %s359_s5, 256 }
  0x4e   : > { %v148_v11 = vadd.f32 %v147_v8, %v142_v4  ;;  %p361_p11 = scmp.lt.s32.totalorder %s572_s17, %s359_s5  ;;  %p362_p12 = scmp.lt.s32.totalorder %s360_s6, %s354_s4 }
  0x4f   : > { %p357_p1 = pneg %p356_p0 }
  0x50   : > { %v154_v13 = vadd.f32 %v153_v9, %v148_v11  ;;  %p363_p3 = por %p362_p12, %p361_p11 }
  0x52   : > { %v160_v14 = vadd.f32 %v159_v12, %v154_v13  ;;  %p364_p5 = pnand %p363_p3, %p357_p1 }
  0x54   : > { %161 = vst [vmem:[%s138_s29] sm:$0xff] %v160_v14 }
  0x55   : > { %367 = shalt.err (!%p364_p5)
}
  0x56   : > { %s368_s7 = scalar_lea.hbm %s577_s26, 128  ;;  %s372_s14 = scalar_lea.hbm %s620_s2, 1024 }
  0x57   : > { %p369_p7 = scmp.ne.s32.totalorder %s577_s26, %s368_s7  ;;  %p373_p2 = scmp.lt.u32.totalorder %s577_s26, %s620_s2 }
  0x58   : > { %p374_p4 = scmp.lt.u32.totalorder %s372_s14, %s368_s7  ;;  %p376_p9 = scmp.lt.u32.totalorder %s368_s7, %s577_s26 }
  0x59   : > { %p370_p8 = pnand %p369_p7, %p628_p13 }
  0x5a   : > { %p375_p6 = por %p374_p4, %p373_p2 }
  0x5b   : > { %p371_p10 = pneg %p370_p8 }
  0x5c   : > { %p377_p0 = por %p376_p9, %p375_p6 }
  0x5e   : > { %p378_p1 = pnand %p377_p0, %p371_p10 }
  0x60   : > { %381 = shalt.err (!%p378_p1)
}
  0x61   : > { %266 = dma.vmem_to_hbm [thread:$0]  (%p628_p13), %s572_s17, 128, %s577_s26, %s163_s28  }
  0x62 PF: > { %p277_p11 = scmp.ge.s32.totalorder %s422_s22, 2  ;;  %s188_s11 = sand.u32 1, %s410_s19  }
  0x63   : > { %p629_p12 = scmp.ne.s32.totalorder %s625_s3, 0  ;;  %s189_s12 = scalar_lea.sflag [#allocation6], %s188_s11 }
  0x65   : > { %p273_p3 = pnand %p277_p11, %p629_p12 }
  0x67   : > { %405 = dma.done.wait (!%p273_p3), %s189_s12, 128  }
  0x68   : > { %407 = vsyncadd (!%p273_p3), %s189_s12, 4294967168  ;;  %p19_p5 = scmp.ge.s32.totalorder %s482_s24, 10   ;;  %s630_s19 = smov %s414_s20 }
  0x69   : > { %s631_s20 = smov %s418_s21  ;;  %s632_s21 = smov %s494_s27 }
  0x6a   : > { %s633_s22 = smov %s482_s24  ;;  %21 = sbr.rel (!%p19_p5) target bundleno = 17 (0x11), region = 72 }
  0x71   :  { %194 = vsyncpa [#allocation5], 1 }
  0x72   :  { %196 = vsyncpa [#allocation5 + $0x1], 1 }
  0x73   :  { %197 = vsyncpa [#allocation6], 1 }
  0x74   :  { %199 = vsyncpa [#allocation6 + $0x1], 1 }

</bundles_post_ra>
